<compile_context>
chip_gen: v7x
topology: tpu7x:2x2x1
jax: 0.10.0
libtpu: 0.0.40
codegen_flags: <defaults>
</compile_context>

<pallas_src>
import functools
from dataclasses import dataclass

import jax
import jax.numpy as jnp
from jax import lax
from jax.experimental import pallas as pl
from jax.experimental.pallas import tpu as pltpu

# Hyperparameters from AdaLoss.__init__ defaults.
TOKEN_TARGET_RATIO = 0.5
TOKEN_LOSS_RATIO = 2.0
TOKEN_MINIMAL = 0.1
TOKEN_MINIMAL_WEIGHT = 1.0


def _adaloss_kernel(ts_ref, sum_ref, min_ref, *, m_total, n_tokens, tile_rows,
                    chunk_rows, n_chunks, tiles_per_split, needs_mask):
    """One (split, tile) grid step.

    ts_ref  : (tile_rows, n_tokens) input tile in VMEM (input dtype, no upcast).
    sum_ref : (chunk_rows, 1) f32 output block -- running per-row-sum partials.
    min_ref : (chunk_rows, 1) f32 output block -- running relu(minimal - mean)
              partials.  Row r accumulates every data row at chunk offset r.
    """
    i_tile = pl.program_id(1)

    # The output blocks are revisited across the inner ("arbitrary") axis, so
    # they act as per-split accumulators: zero them on the first inner step.
    @pl.when(i_tile == 0)
    def _init():
        sum_ref[...] = jnp.zeros_like(sum_ref)
        min_ref[...] = jnp.zeros_like(min_ref)

    in_dtype = ts_ref.dtype
    f32_input = in_dtype == jnp.float32
    dot_dtype = jnp.bfloat16 if f32_input else in_dtype
    # Hoisted out of the chunk loop (JAX does not CSE broadcast_in_dim).
    ones_col = jnp.ones((n_tokens, 1), dtype=dot_dtype)
    inv_n = jnp.float32(1.0 / n_tokens)
    # Logical (unclamped) first row of this tile; phantom tiles (clamped in the
    # index_map) get row ids >= m_total and are fully masked below.
    tile_base = (pl.program_id(0) * tiles_per_split + i_tile) * tile_rows

    def chunk_partials(chunk_idx):
        if n_chunks == 1:
            x = ts_ref[...]
            chunk_base = 0
        else:
            chunk_base = chunk_idx * chunk_rows
            start = chunk_base
            if chunk_rows % 8 == 0:
                start = pl.multiple_of(start, 8)
            x = ts_ref[pl.ds(start, chunk_rows), :]

        # Row sums on the MXU (ones mat-vec) instead of the XLU lane reduce.
        if f32_input:
            # bf16 hi/lo split: two native bf16 MXU passes, ~f32 accuracy,
            # avoids relying on a HIGHEST-precision f32 matmul lowering.
            hi = x.astype(jnp.bfloat16)
            lo = (x - hi.astype(jnp.float32)).astype(jnp.bfloat16)
            row_sum = (jnp.dot(hi, ones_col, preferred_element_type=jnp.float32)
                       + jnp.dot(lo, ones_col, preferred_element_type=jnp.float32))
        else:
            row_sum = jnp.dot(x, ones_col, preferred_element_type=jnp.float32)

        minimal = jnp.maximum(jnp.float32(TOKEN_MINIMAL) - row_sum * inv_n, 0.0)

        if needs_mask:
            # Select (not multiply) so garbage rows of a partial/phantom tile
            # can never poison the accumulators, even if they are NaN/Inf.
            rid = tile_base + chunk_base + lax.broadcasted_iota(
                jnp.int32, (chunk_rows, 1), 0)
            valid = rid < m_total
            row_sum = jnp.where(valid, row_sum, 0.0)
            minimal = jnp.where(valid, minimal, 0.0)
        return row_sum, minimal

    if n_chunks == 1:
        part_sum, part_min = chunk_partials(0)
    else:
        # Accumulate in vreg carries; only one VMEM += per grid step keeps the
        # narrow (rows, 1) accumulator traffic off the store port per chunk.
        def body(ci, carry):
            acc_s, acc_m = carry
            s_i, m_i = chunk_partials(ci)
            return acc_s + s_i, acc_m + m_i

        unroll = 4 if n_chunks % 4 == 0 else (2 if n_chunks % 2 == 0 else 1)
        init = (jnp.zeros((chunk_rows, 1), jnp.float32),
                jnp.zeros((chunk_rows, 1), jnp.float32))
        part_sum, part_min = lax.fori_loop(0, n_chunks, body, init,
                                           unroll=unroll)

    sum_ref[...] += part_sum
    min_ref[...] += part_min


def _vmem_capacity_bytes() -> int:
    try:
        return int(pltpu.get_tpu_info().vmem_capacity_bytes)
    except Exception:  # query unavailable -> assume the smallest (v7x) VMEM
        return 64 * 1024 * 1024


@dataclass(frozen=True)
class _Plan:
    num_splits: int
    tiles_per_split: int
    total_tiles: int
    tile_rows: int
    chunk_rows: int
    n_chunks: int
    needs_mask: bool
    vmem_limit: int


def _plan(m: int, n: int, itemsize: int, chunk_rows=None,
          max_tile_chunks=None) -> _Plan:
    cap = _vmem_capacity_bytes()
    if cap >= 100 * 1024 * 1024:        # v5e / v6e: 128 MiB physical VMEM
        tile_budget = 16 * 1024 * 1024  # per input buffer (x2 double-buffered)
        vmem_limit = 64 * 1024 * 1024
    else:                               # v7x (64 MiB) or unknown
        tile_budget = 12 * 1024 * 1024
        vmem_limit = 40 * 1024 * 1024

    row_bytes = n * itemsize
    ch = chunk_rows
    if ch is None:
        # Rows per in-kernel chunk: bounded so the (ch, 1) row-sum column and
        # the loop carries stay register/VMEM friendly.
        ch = min(128, max(8, ((tile_budget // (2 * row_bytes)) // 8) * 8))
    if m <= ch:
        # Tiny input: one grid step, one chunk, full-extent block (always legal).
        return _Plan(1, 1, 1, m, m, 1, False, vmem_limit)

    cpt = max(1, min(tile_budget // (ch * row_bytes), m // ch))
    if max_tile_chunks is not None:
        cpt = max(1, min(cpt, max_tile_chunks))
    tile_rows = cpt * ch                       # multiple of ch (and of 8)
    total_tiles = pl.cdiv(m, tile_rows)
    num_splits = 2 if total_tiles >= 2 else 1
    tiles_per_split = pl.cdiv(total_tiles, num_splits)
    needs_mask = (num_splits * tiles_per_split * tile_rows) != m
    return _Plan(num_splits, tiles_per_split, total_tiles, tile_rows, ch, cpt,
                 needs_mask, vmem_limit)


def ada_loss(token_select: jax.Array, *, chunk_rows: int | None = None,
             max_tile_chunks: int | None = None) -> jax.Array:
    """Computes AdaLoss()({'token_select': token_select}) with default hparams."""
    n = token_select.shape[-1]
    ts2d = token_select.reshape(-1, n)     # (M, N), token axis on lanes
    m = ts2d.shape[0]
    plan = _plan(m, n, ts2d.dtype.itemsize, chunk_rows, max_tile_chunks)

    kernel = functools.partial(
        _adaloss_kernel,
        m_total=m, n_tokens=n, tile_rows=plan.tile_rows,
        chunk_rows=plan.chunk_rows, n_chunks=plan.n_chunks,
        tiles_per_split=plan.tiles_per_split, needs_mask=plan.needs_mask)

    tps = plan.tiles_per_split
    last_tile = plan.total_tiles - 1

    def in_index(c, i):
        # Clamp phantom tiles (odd tile count split 2 ways) onto the last real
        # tile; their rows are masked out inside the kernel.
        return (jnp.minimum(c * tps + i, last_tile), 0)

    in_spec = pl.BlockSpec((plan.tile_rows, n), in_index)
    out_spec = pl.BlockSpec((None, plan.chunk_rows, 1), lambda c, i: (c, 0, 0))
    part_shape = jax.ShapeDtypeStruct((plan.num_splits, plan.chunk_rows, 1),
                                      jnp.float32)

    sums, mins = pl.pallas_call(
        kernel,
        out_shape=(part_shape, part_shape),
        grid=(plan.num_splits, tps),
        in_specs=[in_spec],
        out_specs=(out_spec, out_spec),
        compiler_params=pltpu.CompilerParams(
            # Leading split axis is independent ("parallel") so a multi-core
            # part can shard it; the tile axis carries the accumulation.
            dimension_semantics=("parallel", "arbitrary"),
            vmem_limit_bytes=plan.vmem_limit,
        ),
    )(ts2d)

    # Tiny finalize in the wrapper (per perf review): combine per-split partial
    # vectors and apply the scalar loss math.
    total_sum = jnp.sum(sums)
    total_min = jnp.sum(mins)
    token_mean = total_sum / jnp.float32(m * n)
    token_flops_loss = (token_mean - TOKEN_TARGET_RATIO) ** 2
    token_loss = token_flops_loss + TOKEN_MINIMAL_WEIGHT * total_min
    return TOKEN_LOSS_RATIO * token_loss


def _ada_loss_ref(token_select: jax.Array) -> jax.Array:
    """Pure-JAX reference mirroring the PyTorch forward."""
    ts = token_select.astype(jnp.float32)
    token_mean = ts.mean()
    token_flops_loss = (token_mean - TOKEN_TARGET_RATIO) ** 2
    row_mean = ts.mean(-1)
    token_minimal_loss = jnp.maximum(TOKEN_MINIMAL - row_mean, 0.0).sum()
    token_loss = token_flops_loss + TOKEN_MINIMAL_WEIGHT * token_minimal_loss
    return TOKEN_LOSS_RATIO * token_loss


if __name__ == "__main__":
    key = jax.random.PRNGKey(0)
    k1, k2, k3 = jax.random.split(key, 3)

    # 1) f32 soft gates in [0, 0.2] (exercises both loss terms robustly):
    #    batch=2, layers=8, tokens=128 -> single-tile fast path.
    ts1 = jax.random.uniform(k1, (2, 8, 128), dtype=jnp.float32) * 0.2
    loss1 = jax.block_until_ready(ada_loss(ts1))
    ref1 = _ada_loss_ref(ts1)
    assert jnp.allclose(loss1, ref1, rtol=2e-5, atol=1e-6), (loss1, ref1)

    # 2) bf16 input, row count not a multiple of 8: native bf16 MXU row sums,
    #    full-extent (21, 256) block.
    ts2 = (jax.random.uniform(k2, (3, 7, 256), dtype=jnp.float32) * 0.2
           ).astype(jnp.bfloat16)
    loss2 = jax.block_until_ready(ada_loss(ts2))
    ref2 = _ada_loss_ref(ts2)
    assert jnp.allclose(loss2, ref2, rtol=1e-4, atol=1e-4), (loss2, ref2)

    # 3) forced tiny tiles: exercises the in-kernel chunk loop, the 2-way
    #    split axis, the masked partial tile and the clamped phantom tile.
    ts3 = jax.random.uniform(k3, (4, 10, 128), dtype=jnp.float32) * 0.2
    loss3 = jax.block_until_ready(ada_loss(ts3, chunk_rows=8, max_tile_chunks=2))
    ref3 = _ada_loss_ref(ts3)
    assert jnp.allclose(loss3, ref3, rtol=2e-5, atol=1e-6), (loss3, ref3)

    print("KERNEL_OK")
</pallas_src>

<mosaic_0001>
module attributes {stable_mosaic.version = 11 : i64} {
  func.func @_adaloss_kernel(%arg0: i32, %arg1: i32, %arg2: memref<16x128xf32, #tpu.memory_space<vmem>>, %arg3: memref<1x16x1xf32, #tpu.memory_space<vmem>>, %arg4: memref<1x16x1xf32, #tpu.memory_space<vmem>>) attributes {dimension_semantics = [#tpu.dimension_semantics<parallel>, #tpu.dimension_semantics<arbitrary>], iteration_bounds = array<i64: 1, 1>, scalar_prefetch = 0 : i64, scratch_operands = 0 : i64, tpu.core_type = #tpu.core_type<tc>, window_params = [{transform_indices = @transform_0, window_bounds = array<i64: 16, 128>}, {transform_indices = @transform_1, window_bounds = array<i64: 1, 16, 1>}, {transform_indices = @transform_2, window_bounds = array<i64: 1, 16, 1>}]} {
    %c0_i32 = arith.constant 0 : i32
    %0 = arith.cmpi eq, %arg1, %c0_i32 : i32
    %1 = arith.extui %0 : i1 to i32
    %c0_i32_0 = arith.constant 0 : i32
    %2 = arith.cmpi ne, %1, %c0_i32_0 : i32
    scf.if %2 {
      %cst_19 = arith.constant 0.000000e+00 : f32
      %30 = vector.broadcast %cst_19 : f32 to vector<16x1xf32>
      %c0_20 = arith.constant 0 : index
      %c0_21 = arith.constant 0 : index
      %c0_22 = arith.constant 0 : index
      %31 = vector.load %arg3[%c0_20, %c0_21, %c0_22] : memref<1x16x1xf32, #tpu.memory_space<vmem>>, vector<1x16x1xf32>
      %32 = vector.shape_cast %31 : vector<1x16x1xf32> to vector<16x1xf32>
      %33 = vector.shape_cast %30 : vector<16x1xf32> to vector<1x16x1xf32>
      tpu.vector_store %arg3[%c0_20, %c0_21, %c0_22], %33 {strides = array<i32>} : memref<1x16x1xf32, #tpu.memory_space<vmem>>, vector<1x16x1xf32>,
      %cst_23 = arith.constant 0.000000e+00 : f32
      %34 = vector.broadcast %cst_23 : f32 to vector<16x1xf32>
      %c0_24 = arith.constant 0 : index
      %c0_25 = arith.constant 0 : index
      %c0_26 = arith.constant 0 : index
      %35 = vector.load %arg4[%c0_24, %c0_25, %c0_26] : memref<1x16x1xf32, #tpu.memory_space<vmem>>, vector<1x16x1xf32>
      %36 = vector.shape_cast %35 : vector<1x16x1xf32> to vector<16x1xf32>
      %37 = vector.shape_cast %34 : vector<16x1xf32> to vector<1x16x1xf32>
      tpu.vector_store %arg4[%c0_24, %c0_25, %c0_26], %37 {strides = array<i32>} : memref<1x16x1xf32, #tpu.memory_space<vmem>>, vector<1x16x1xf32>,
    } else {
    }
    %cst = arith.constant 1.000000e+00 : bf16
    %3 = vector.broadcast %cst : bf16 to vector<128x1xbf16>
    %c0 = arith.constant 0 : index
    %c0_1 = arith.constant 0 : index
    %4 = vector.load %arg2[%c0, %c0_1] : memref<16x128xf32, #tpu.memory_space<vmem>>, vector<16x128xf32>
    %5 = arith.truncf %4 : vector<16x128xf32> to vector<16x128xbf16>
    %6 = arith.extf %5 : vector<16x128xbf16> to vector<16x128xf32>
    %7 = arith.subf %4, %6 : vector<16x128xf32>
    %8 = arith.truncf %7 : vector<16x128xf32> to vector<16x128xbf16>
    %cst_2 = arith.constant dense<0.000000e+00> : vector<16x1xf32>
    %9 = tpu.matmul %5, %3, %cst_2 {dimension_numbers = #tpu.dot_dimension_numbers<[1], [0], [0], [1], [0, 0, 1, 1], [], []>} : vector<16x128xbf16>, vector<128x1xbf16>, vector<16x1xf32> -> vector<16x1xf32>
    %cst_3 = arith.constant dense<0.000000e+00> : vector<16x1xf32>
    %10 = tpu.matmul %8, %3, %cst_3 {dimension_numbers = #tpu.dot_dimension_numbers<[1], [0], [0], [1], [0, 0, 1, 1], [], []>} : vector<16x128xbf16>, vector<128x1xbf16>, vector<16x1xf32> -> vector<16x1xf32>
    %11 = arith.addf %9, %10 : vector<16x1xf32>
    %cst_4 = arith.constant 7.812500e-03 : f32
    %12 = vector.broadcast %cst_4 : f32 to vector<16x1xf32>
    %13 = arith.mulf %11, %12 : vector<16x1xf32>
    %cst_5 = arith.constant 1.000000e-01 : f32
    %14 = vector.broadcast %cst_5 : f32 to vector<16x1xf32>
    %15 = arith.subf %14, %13 : vector<16x1xf32>
    %cst_6 = arith.constant 0.000000e+00 : f32
    %16 = vector.broadcast %cst_6 : f32 to vector<16x1xf32>
    %17 = arith.maximumf %15, %16 : vector<16x1xf32>
    %c0_7 = arith.constant 0 : index
    %c0_8 = arith.constant 0 : index
    %c0_9 = arith.constant 0 : index
    %18 = vector.load %arg3[%c0_7, %c0_8, %c0_9] : memref<1x16x1xf32, #tpu.memory_space<vmem>>, vector<1x16x1xf32>
    %19 = vector.shape_cast %18 : vector<1x16x1xf32> to vector<16x1xf32>
    %20 = arith.addf %19, %11 : vector<16x1xf32>
    %c0_10 = arith.constant 0 : index
    %c0_11 = arith.constant 0 : index
    %c0_12 = arith.constant 0 : index
    %21 = vector.load %arg3[%c0_10, %c0_11, %c0_12] : memref<1x16x1xf32, #tpu.memory_space<vmem>>, vector<1x16x1xf32>
    %22 = vector.shape_cast %21 : vector<1x16x1xf32> to vector<16x1xf32>
    %23 = vector.shape_cast %20 : vector<16x1xf32> to vector<1x16x1xf32>
    tpu.vector_store %arg3[%c0_10, %c0_11, %c0_12], %23 {strides = array<i32>} : memref<1x16x1xf32, #tpu.memory_space<vmem>>, vector<1x16x1xf32>,
    %c0_13 = arith.constant 0 : index
    %c0_14 = arith.constant 0 : index
    %c0_15 = arith.constant 0 : index
    %24 = vector.load %arg4[%c0_13, %c0_14, %c0_15] : memref<1x16x1xf32, #tpu.memory_space<vmem>>, vector<1x16x1xf32>
    %25 = vector.shape_cast %24 : vector<1x16x1xf32> to vector<16x1xf32>
    %26 = arith.addf %25, %17 : vector<16x1xf32>
    %c0_16 = arith.constant 0 : index
    %c0_17 = arith.constant 0 : index
    %c0_18 = arith.constant 0 : index
    %27 = vector.load %arg4[%c0_16, %c0_17, %c0_18] : memref<1x16x1xf32, #tpu.memory_space<vmem>>, vector<1x16x1xf32>
    %28 = vector.shape_cast %27 : vector<1x16x1xf32> to vector<16x1xf32>
    %29 = vector.shape_cast %26 : vector<16x1xf32> to vector<1x16x1xf32>
    tpu.vector_store %arg4[%c0_16, %c0_17, %c0_18], %29 {strides = array<i32>} : memref<1x16x1xf32, #tpu.memory_space<vmem>>, vector<1x16x1xf32>,
    return
  }
  func.func @transform_0(%arg0: i32, %arg1: i32) -> (i32, i32) {
    %c1_i32 = arith.constant 1 : i32
    %0 = arith.muli %arg0, %c1_i32 : i32
    %1 = arith.addi %0, %arg1 : i32
    %c0_i32 = arith.constant 0 : i32
    %2 = arith.minsi %1, %c0_i32 : i32
    %c0_i32_0 = arith.constant 0 : i32
    %c0_i32_1 = arith.constant 0 : i32
    return %2, %c0_i32_0 : i32, i32
  }
  func.func @transform_1(%arg0: i32, %arg1: i32) -> (i32, i32, i32) {
    %c0_i32 = arith.constant 0 : i32
    %c0_i32_0 = arith.constant 0 : i32
    %c0_i32_1 = arith.constant 0 : i32
    return %arg0, %c0_i32, %c0_i32_0 : i32, i32, i32
  }
  func.func @transform_2(%arg0: i32, %arg1: i32) -> (i32, i32, i32) {
    %c0_i32 = arith.constant 0 : i32
    %c0_i32_0 = arith.constant 0 : i32
    %c0_i32_1 = arith.constant 0 : i32
    return %arg0, %c0_i32, %c0_i32_0 : i32, i32, i32
  }
}

</mosaic_0001>

<bundles_post_ra>
// kernel: tpu_custom_call.1
= control target key start
LH: loop header
LB: loop body
LE: loop exit
PB: predicated region body
PF: predicated region fallthrough
CT: control target
= control target key end

     0   :  { %8 = vsyncpa [#allocation3], 0  ;;  %s255_s9 = smov [#allocation2]   ;;  %s332_s0 = inlined_call_operand.hbm [shape: f32[16,128], index: 0, kind: input, shape index: {}]   ;;  %s333_s1 = inlined_call_operand.vmem [shape: f32[1,16,1], index: 1, kind: output, shape index: {0}]   ;;  %s334_s2 = inlined_call_operand.vmem [shape: f32[1,16,1], index: 2, kind: output, shape index: {1}]  }
   0x1   :  { %s20_s10 = sshll.u32 %s255_s9, 4  ;;  %s231_s13 = scalar_lea.hbm %s332_s0, 256  ;;  %s21_s10 = int_to_ptr.vmem [resolvable:$true] %s20_s10 }
   0x2   :  { %p232_p0 = scmp.ne.s32.totalorder %s332_s0, %s231_s13  ;;  %p235_p1 = scmp.lt.u32.totalorder %s231_s13, %s332_s0 }
   0x4   :  { %p237_p2 = pnand %p235_p1, %p232_p0 }
   0x6   :  { %240 = shalt.err (!%p237_p2)
}
   0x7   :  { %s241_s18 = scalar_lea.vmem %s21_s10, 256  ;;  %p246_p4 = scmp.lt.s32.totalorder %s21_s10, %s21_s10 }
   0x8   :  { %p242_p3 = scmp.ne.s32.totalorder %s21_s10, %s241_s18  ;;  %p247_p5 = scmp.lt.s32.totalorder %s241_s18, %s241_s18 }
   0xa   :  { %p248_p6 = por %p247_p5, %p246_p4 }
   0xc   :  { %p249_p7 = pnand %p248_p6, %p242_p3 }
   0xe   :  { %252 = shalt.err (!%p249_p7)
}
   0xf   :  { %s256_s19 = smov 128   ;;  %s257_s20 = smov 8  }
  0x10   :  { %26 = dma.hbm_to_vmem [thread:$0]  %s332_s0, 256, %s21_s10, [#allocation3], %s256_s19, %s256_s19, %s257_s20  }
  0x11   :  { %253 = dma.done.wait [#allocation3], 256  }
  0x12   :  { %254 = vsyncadd [#allocation3], 4294967040  ;;  %v258_v0 = vmov 0.0   ;;  %v259_v1 = vmov 1065369472   ;;  %vm260_vm0 = vmmov 0  }
  0x13   :  { %183 = vmatprep.subr.bf16.mxu1 %v258_v0  ;;  %203 = vmatprep.subr.bf16.mxu0 %v258_v0  ;;  %v45_v2 = vld [vmem:[#allocation2] sm:$0xff]  ;;  %v46_v3 = vld [vmem:[#allocation2 + $0x8] sm:$0xff]  ;;  %vm40_vm1 = vcmask 7168  }
  0x14   :  { %184 = vmatpush3.bf16.msra.mxu1 %v259_v1  ;;  %204 = vmatpush3.bf16.msra.mxu0 %v259_v1  ;;  %v47_v4 = vpack.c.bf16 %v46_v3, %v45_v2  ;;  %41 = vst.msk [vmem:[%s333_s1] sm:$0xff] %vm40_vm1, %v258_v0  ;;  %43 = vst.msk [vmem:[%s334_s2] sm:$0xff] %vm40_vm1, %v258_v0 }
  0x15   :  { %185 = vmatprep.subr.bf16.mxu1 %v258_v0  ;;  %205 = vmatprep.subr.bf16.mxu0 %v258_v0  ;;  %42 = vst.msk [vmem:[%s333_s1 + $0x8] sm:$0xff] %vm40_vm1, %v258_v0  ;;  %44 = vst.msk [vmem:[%s334_s2 + $0x8] sm:$0xff] %vm40_vm1, %v258_v0 }
  0x16   :  { %199 = vmatprep.mubr.msk.bf16.mxu1 %vm260_vm0, %v258_v0  ;;  %219 = vmatprep.mubr.msk.bf16.mxu0 %vm260_vm0, %v258_v0  ;;  %v48_v5 = vunpack.c.l.bf16 %v47_v4  ;;  %v49_v6 = vunpack.c.h.bf16 %v47_v4 }
  0x18   :  { %186 = vmatpush3.bf16.msra.mxu1 %v259_v1  ;;  %206 = vmatpush3.bf16.msra.mxu0 %v259_v1  ;;  %v50_v7 = vsub.f32 %v45_v2, %v48_v5  ;;  %v51_v8 = vsub.f32 %v46_v3, %v49_v6 }
  0x19   :  { %187 = vmatprep.subr.bf16.mxu1 %v258_v0  ;;  %207 = vmatprep.subr.bf16.mxu0 %v258_v0 }
  0x1a   :  { %v52_v9 = vpack.c.bf16 %v51_v8, %v50_v7 }
  0x1b   :  { %v141_v12 = vld [vmem:[%s333_s1] sm:$0xff] }
  0x1c   :  { %188 = vmatpush3.bf16.msra.mxu1 %v259_v1  ;;  %208 = vmatpush3.bf16.msra.mxu0 %v259_v1  ;;  %v142_v18 = vld [vmem:[%s333_s1 + $0x8] sm:$0xff]  ;;  %v148_v27 = vld [vmem:[%s334_s2] sm:$0xff] }
  0x1d   :  { %189 = vmatprep.subr.bf16.mxu1 %v258_v0  ;;  %209 = vmatprep.subr.bf16.mxu0 %v258_v0  ;;  %v149_v30 = vld [vmem:[%s334_s2 + $0x8] sm:$0xff] }
  0x20   :  { %190 = vmatpush3.bf16.msra.mxu1 %v259_v1  ;;  %210 = vmatpush3.bf16.msra.mxu0 %v259_v1 }
  0x21   :  { %191 = vmatprep.subr.bf16.mxu1 %v258_v0  ;;  %211 = vmatprep.subr.bf16.mxu0 %v258_v0 }
  0x24   :  { %192 = vmatpush3.bf16.msra.mxu1 %v259_v1  ;;  %212 = vmatpush3.bf16.msra.mxu0 %v259_v1 }
  0x25   :  { %193 = vmatprep.subr.bf16.mxu1 %v258_v0  ;;  %213 = vmatprep.subr.bf16.mxu0 %v258_v0 }
  0x28   :  { %194 = vmatpush3.bf16.msra.mxu1 %v259_v1  ;;  %214 = vmatpush3.bf16.msra.mxu0 %v259_v1 }
  0x29   :  { %195 = vmatprep.subr.bf16.mxu1 %v258_v0  ;;  %215 = vmatprep.subr.bf16.mxu0 %v258_v0 }
  0x2c   :  { %196 = vmatpush3.bf16.msra.mxu1 %v259_v1  ;;  %216 = vmatpush3.bf16.msra.mxu0 %v259_v1 }
  0x2d   :  { %197 = vmatprep.subr.bf16.mxu1 %v258_v0  ;;  %217 = vmatprep.subr.bf16.mxu0 %v258_v0 }
  0x30   :  { %198 = vmatpush3.bf16.msra.mxu1 %v259_v1  ;;  %218 = vmatpush3.bf16.msra.mxu0 %v259_v1 }
  0x33   :  { %200 = vmatmul.mubr.bf16.vlgmr.msra.gmra.mrb[0].mxu1 %v52_v9  ;;  %220 = vmatmul.mubr.bf16.vlgmr.msra.gmra.mrb[0].mxu0 %v47_v4 }
 0x106   :  { %v87_v10 = vpop.f32.mrb[0].mxu1  ;;  %v128_v11 = vpop.f32.mrb[0].mxu0 }
 0x107   :  { %v129_v13 = vadd.f32 %v128_v11, %v87_v10  ;;  %v201_v14 = vpop.f32.mrb[1].mxu1  ;;  %v221_v15 = vpop.f32.mrb[1].mxu0 }
 0x108   :  { %v90_v16 = vpop.f32.mrb[2].mxu1  ;;  %v131_v17 = vpop.f32.mrb[2].mxu0 }
 0x109   :  { %v135_v19 = vmul.f32 0.0078125, %v129_v13  ;;  %v143_v20 = vadd.f32 %v141_v12, %v129_v13  ;;  %v132_v21 = vadd.f32 %v131_v17, %v90_v16  ;;  %v202_v22 = vpop.f32.mrb[3].mxu1  ;;  %v222_v23 = vpop.f32.mrb[3].mxu0 }
 0x10b   :  { %v137_v24 = vsub.f32 0.1, %v135_v19  ;;  %146 = vst.msk [vmem:[%s333_s1] sm:$0xff] %vm40_vm1, %v143_v20  ;;  %v136_v25 = vmul.f32 0.0078125, %v132_v21  ;;  %v144_v26 = vadd.f32 %v142_v18, %v132_v21 }
 0x10d   :  { %v139_v28 = vmax.f32 %v137_v24, 0.0  ;;  %v138_v29 = vsub.f32 0.1, %v136_v25  ;;  %147 = vst.msk [vmem:[%s333_s1 + $0x8] sm:$0xff] %vm40_vm1, %v144_v26 }
 0x10f   :  { %v150_v31 = vadd.f32 %v148_v27, %v139_v28  ;;  %v140_v32 = vmax.f32 %v138_v29, 0.0 }
 0x111   :  { %152 = vst.msk [vmem:[%s334_s2] sm:$0xff] %vm40_vm1, %v150_v31  ;;  %v151_v33 = vadd.f32 %v149_v30, %v140_v32 }
 0x113   :  { %153 = vst.msk [vmem:[%s334_s2 + $0x8] sm:$0xff] %vm40_vm1, %v151_v33 }
 0x114   :  { %162 = vsyncpa [#allocation3], 1 }

</bundles_post_ra>
